<compile_context>
chip_gen: v7x
topology: tpu7x:2x2x1
jax: 0.10.0
libtpu: 0.0.40
codegen_flags: <defaults>
</compile_context>

<pallas_src>
import functools

import jax
import jax.numpy as jnp
from jax.experimental import pallas as pl
from jax.experimental.pallas import tpu as pltpu

TM_DEFAULT = 1024   # cap on rows per tile (multiple of 8)
TN_DEFAULT = 2048   # cap on output cols per tile when W can't stay resident


def _round_up(x, m):
    return (x + m - 1) // m * m


def _cdiv(a, b):
    return (a + b - 1) // b


def _linear_kernel(x_ref, wt_ref, b_ref, o_ref):
    # x_ref : (TM, K) input dtype    wt_ref : (K, TN) compute dtype (bf16)
    # b_ref : (1, TN) f32            o_ref  : (TM, TN) out dtype
    xv = x_ref[...].astype(wt_ref.dtype)          # in-kernel cast (VPU, cheap)
    acc = jnp.dot(xv, wt_ref[...], preferred_element_type=jnp.float32)
    o_ref[...] = (acc + b_ref[...]).astype(o_ref.dtype)


def prepare_linear_params(weight, bias, *, compute_dtype=jnp.bfloat16):
    """One-time (init-time) parameter prep.

    weight : [dim, size]  (PyTorch nn.Linear convention)
    bias   : [dim]
    Returns (W^T zero-padded to [size, n_pad] in compute_dtype,
             bias zero-padded to [1, n_pad] in f32), with n_pad = ceil128(dim).
    The transpose / pad / cast is paid once, not per forward call.
    """
    dim, size = weight.shape
    n_pad = _round_up(dim, 128)
    wt = jnp.zeros((size, n_pad), compute_dtype)
    wt = wt.at[:, :dim].set(weight.T.astype(compute_dtype))
    b = jnp.zeros((1, n_pad), jnp.float32)
    b = b.at[:, :dim].set(bias.astype(jnp.float32))
    return wt, b


def _vmem_ceiling_bytes():
    """Usable VMEM for this kernel: 3/4 of physical capacity (headroom for
    Mosaic's own scratch). 96 MiB on 128-MiB chips, 48 MiB on v7x."""
    try:
        cap = int(pltpu.get_tpu_info().vmem_capacity_bytes)
    except Exception:
        cap = 64 << 20   # conservative fallback
    return (cap * 3) // 4


@functools.partial(jax.jit, static_argnames=("out_dim", "out_dtype", "tm", "tn"))
def linear_embedding(x, wt_padded, bias_padded, out_dim, *, out_dtype=None,
                     tm=TM_DEFAULT, tn=TN_DEFAULT):
    """Pallas forward of nn.Linear(size, dim): returns [..., out_dim].

    x           : [..., size]   (any float dtype; cast to bf16 in-kernel)
    wt_padded   : [size, n_pad] from prepare_linear_params (already W^T)
    bias_padded : [1, n_pad]    f32
    """
    *lead, size = x.shape
    k, n_pad = wt_padded.shape
    assert k == size, "wt_padded does not match x's feature size"
    compute_dtype = wt_padded.dtype
    out_dtype = compute_dtype if out_dtype is None else out_dtype

    M = 1
    for d in lead:
        M *= d
    M = max(M, 1)
    m8 = _round_up(M, 8)

    x_it = jnp.dtype(x.dtype).itemsize
    w_it = jnp.dtype(compute_dtype).itemsize
    out_it = jnp.dtype(out_dtype).itemsize

    ceiling = _vmem_ceiling_bytes()
    budget = max(ceiling - (4 << 20), 8 << 20)

    # ---- N tile: keep the whole (double-buffered) weight resident in VMEM
    # when it uses at most half the budget -> W is fetched from HBM once.
    if 2 * size * n_pad * w_it <= budget // 2:
        tn_eff = n_pad
    else:
        tn_eff = 128
        for t in range(max(min(tn, n_pad) // 128, 1), 0, -1):
            if n_pad % (t * 128) == 0:
                tn_eff = t * 128
                break
    n_blocks = n_pad // tn_eff

    # ---- M tile: balanced split, sized to the remaining VMEM budget.
    fixed = 2 * (size * tn_eff * w_it + tn_eff * 4)          # W + bias buffers
    per_row = 2 * (size * x_it + tn_eff * out_it)            # x + out per row
    tm_budget = max((budget - fixed) // max(per_row, 1), 8)
    tm_cap = max((min(tm, tm_budget) // 8) * 8, 8)
    nm = _cdiv(m8, tm_cap)
    # Ensure >=2 grid blocks so v7x's second TensorCore isn't idle.
    if nm == 1 and n_blocks == 1 and m8 >= 16:
        nm = 2
    tm_eff = _round_up(_cdiv(m8, nm), 8)
    m_pad = nm * tm_eff

    # ---- Activations: reshape only; pad rows only when actually needed.
    x2d = x.reshape(M, size)
    if m_pad != M:
        x2d = jnp.pad(x2d, ((0, m_pad - M), (0, 0)))

    buf_bytes = fixed + 2 * tm_eff * (size * x_it + tn_eff * out_it)
    vmem_limit = int(min(max(buf_bytes + (4 << 20), 32 << 20), ceiling))

    w_streams = 1 if n_blocks == 1 else nm   # resident W -> fetched once
    cost = pl.CostEstimate(
        flops=2 * M * out_dim * size,
        transcendentals=0,
        bytes_accessed=(m_pad * size * x_it
                        + w_streams * size * n_pad * w_it
                        + n_pad * 4
                        + m_pad * n_pad * out_it),
    )

    out = pl.pallas_call(
        _linear_kernel,
        out_shape=jax.ShapeDtypeStruct((m_pad, n_pad), out_dtype),
        grid_spec=pltpu.PrefetchScalarGridSpec(
            num_scalar_prefetch=0,
            grid=(nm, n_blocks),
            in_specs=[
                pl.BlockSpec((tm_eff, size), lambda i, j: (i, 0)),
                pl.BlockSpec((size, tn_eff), lambda i, j: (0, j)),
                pl.BlockSpec((1, tn_eff), lambda i, j: (0, j)),
            ],
            out_specs=pl.BlockSpec((tm_eff, tn_eff), lambda i, j: (i, j)),
        ),
        compiler_params=pltpu.CompilerParams(
            dimension_semantics=("parallel", "parallel"),
            vmem_limit_bytes=vmem_limit,
        ),
        cost_estimate=cost,
    )(x2d, wt_padded, bias_padded)

    out = out[:M, :out_dim]
    return out.reshape(*lead, out_dim)


if __name__ == "__main__":
    # Small shapes consistent with the module (Linear acts on the last axis).
    B, S, SIZE, DIM = 2, 8, 32, 64

    key = jax.random.PRNGKey(0)
    kx, kw, kb = jax.random.split(key, 3)

    # nn.Linear default init: U(-1/sqrt(size), 1/sqrt(size)).
    bound = 1.0 / (SIZE ** 0.5)
    weight = jax.random.uniform(kw, (DIM, SIZE), jnp.float32, -bound, bound)
    bias = jax.random.uniform(kb, (DIM,), jnp.float32, -bound, bound)
    x = jax.random.normal(kx, (B, S, SIZE), jnp.float32)

    # One-time parameter prep (hoisted transpose + 128-pad of N + bf16 cast).
    wt_p, b_p = prepare_linear_params(weight, bias)

    y = linear_embedding(x, wt_p, b_p, DIM)
    y = jax.block_until_ready(y)
    assert y.shape == (B, S, DIM)
    y32 = y.astype(jnp.float32)

    # Reference with identically bf16-quantized operands + f32 accumulation
    # (isolates kernel math from the bf16 storage/output quantization).
    xq = x.astype(jnp.bfloat16).astype(jnp.float32)
    wq = weight.astype(jnp.bfloat16).astype(jnp.float32)
    y_ref = jnp.einsum("bsk,nk->bsn", xq, wq,
                       precision=jax.lax.Precision.HIGHEST) + bias
    assert jnp.allclose(y32, y_ref, atol=2e-2, rtol=2e-2)

    # Loose sanity check against the pure-f32 PyTorch-equivalent math.
    y_f32 = x @ weight.T + bias
    assert jnp.allclose(y32, y_f32, atol=8e-2, rtol=8e-2)

    print("KERNEL_OK")
</pallas_src>

<mosaic_0001>
module attributes {stable_mosaic.version = 11 : i64} {
  func.func @_linear_kernel(%arg0: i32, %arg1: i32, %arg2: memref<8x32xf32, #tpu.memory_space<vmem>>, %arg3: memref<32x128xbf16, #tpu.memory_space<vmem>>, %arg4: memref<1x128xf32, #tpu.memory_space<vmem>>, %arg5: memref<8x128xbf16, #tpu.memory_space<vmem>>) attributes {dimension_semantics = [#tpu.dimension_semantics<parallel>, #tpu.dimension_semantics<parallel>], iteration_bounds = array<i64: 2, 1>, scalar_prefetch = 0 : i64, scratch_operands = 0 : i64, tpu.core_type = #tpu.core_type<tc>, window_params = [{transform_indices = @transform_0, window_bounds = array<i64: 8, 32>}, {transform_indices = @transform_1, window_bounds = array<i64: 32, 128>}, {transform_indices = @transform_2, window_bounds = array<i64: 1, 128>}, {transform_indices = @transform_3, window_bounds = array<i64: 8, 128>}]} {
    %c0 = arith.constant 0 : index
    %c0_0 = arith.constant 0 : index
    %0 = vector.load %arg2[%c0, %c0_0] : memref<8x32xf32, #tpu.memory_space<vmem>>, vector<8x32xf32>
    %1 = arith.truncf %0 : vector<8x32xf32> to vector<8x32xbf16>
    %c0_1 = arith.constant 0 : index
    %c0_2 = arith.constant 0 : index
    %2 = vector.load %arg3[%c0_1, %c0_2] : memref<32x128xbf16, #tpu.memory_space<vmem>>, vector<32x128xbf16>
    %cst = arith.constant dense<0.000000e+00> : vector<8x128xf32>
    %3 = tpu.matmul %1, %2, %cst {dimension_numbers = #tpu.dot_dimension_numbers<[1], [0], [0], [1], [0, 0, 1, 1], [], []>} : vector<8x32xbf16>, vector<32x128xbf16>, vector<8x128xf32> -> vector<8x128xf32>
    %c0_3 = arith.constant 0 : index
    %c0_4 = arith.constant 0 : index
    %4 = vector.load %arg4[%c0_3, %c0_4] : memref<1x128xf32, #tpu.memory_space<vmem>>, vector<1x128xf32>
    %5 = vector.broadcast %4 : vector<1x128xf32> to vector<8x128xf32>
    %6 = arith.addf %3, %5 : vector<8x128xf32>
    %7 = arith.truncf %6 : vector<8x128xf32> to vector<8x128xbf16>
    %c0_5 = arith.constant 0 : index
    %c0_6 = arith.constant 0 : index
    %8 = vector.load %arg5[%c0_5, %c0_6] : memref<8x128xbf16, #tpu.memory_space<vmem>>, vector<8x128xbf16>
    tpu.vector_store %arg5[%c0_5, %c0_6], %7 {strides = array<i32>} : memref<8x128xbf16, #tpu.memory_space<vmem>>, vector<8x128xbf16>,
    return
  }
  func.func @transform_0(%arg0: i32, %arg1: i32) -> (i32, i32) {
    %c0_i32 = arith.constant 0 : i32
    %c0_i32_0 = arith.constant 0 : i32
    return %arg0, %c0_i32 : i32, i32
  }
  func.func @transform_1(%arg0: i32, %arg1: i32) -> (i32, i32) {
    %c0_i32 = arith.constant 0 : i32
    %c0_i32_0 = arith.constant 0 : i32
    return %c0_i32, %arg1 : i32, i32
  }
  func.func @transform_2(%arg0: i32, %arg1: i32) -> (i32, i32) {
    %c0_i32 = arith.constant 0 : i32
    %c0_i32_0 = arith.constant 0 : i32
    return %c0_i32, %arg1 : i32, i32
  }
  func.func @transform_3(%arg0: i32, %arg1: i32) -> (i32, i32) {
    %c0_i32 = arith.constant 0 : i32
    return %arg0, %arg1 : i32, i32
  }
}

</mosaic_0001>

<bundles_post_ra>
// kernel: linear_embedding.1
= control target key start
LH: loop header
LB: loop body
LE: loop exit
PB: predicated region body
PF: predicated region fallthrough
CT: control target
= control target key end

     0   :  { %8 = vsyncpa [#allocation3], 0  ;;  %s820_s0 = inlined_call_operand.hbm [shape: f32[16,32], index: 0, kind: input, shape index: {}]   ;;  %s821_s1 = inlined_call_operand.hbm [shape: bf16[32,128], index: 1, kind: input, shape index: {}]   ;;  %s822_s2 = inlined_call_operand.vmem [shape: f32[1,128], index: 2, kind: input, shape index: {}]   ;;  %s823_s3 = inlined_call_operand.vmem [shape: bf16[16,128], index: 3, kind: output, shape index: {}]  }
   0x1   :  { %10 = vsyncpa [#allocation3 + $0x1], 0 }
   0x2   :  { %11 = vsyncpa [#allocation5], 0  ;;  %s662_s12 = smov 0   ;;  %s664_s13 = smov 0  }
   0x3   :  { %s666_s14 = smov 0   ;;  %s668_s15 = smov 0  }
   0x4   :  { %s670_s16 = smov 0   ;;  %s672_s17 = smov 0  }
   0x5 LB: > { %s421_s18 = sadd.s32 4294967295, %s634_s17   ;;  %p49_p0 = scmp.ne.s32.totalorder %s618_s13, %s614_s12  ;;  %s634_s17 = sphi %s672_s17, %s17_s17   ;;  %s630_s16 = sphi %s670_s16, %s840_s16   ;;  %s626_s15 = sphi %s668_s15, %s839_s15   ;;  %s622_s14 = sphi %s666_s14, %s838_s14   ;;  %s618_s13 = sphi %s664_s13, %s837_s13   ;;  %s614_s12 = sphi %s662_s12, %s836_s12  }
   0x6   : > { %p692_p1 = scmp.eq.s32.totalorder %s421_s18, 0  ;;  %p423_p2 = scmp.ge.s32.totalorder %s634_s17, 1 }
   0x7   : > { %p140_p3 = scmp.lt.s32.totalorder %s634_s17, 3  ;;  %s636_s22 = smov [#allocation4]  }
   0x8   : > { %s828_s19 = scalar_select %p692_p1, 1, 0 }
   0x9   : > { %p700_p4 = por %p692_p1, %p49_p0  ;;  %p704_p5 = pnand %p423_p2, %p140_p3 }
   0xa   : > { %s154_s23 = sshll.u32 %s636_s22, 4  ;;  %s29_s25 = sadd.s32 1, %s630_s16  ;;  %s155_s23 = int_to_ptr.vmem [resolvable:$true] %s154_s23 }
   0xb   : > { %s829_s20 = scalar_select %p700_p4, 1, 0 }
   0xc   : > { %s830_s21 = scalar_select %p704_p5, 1, 0 }
   0xd   : > { %p456_p6 = pneg %p704_p5  ;;  %s522_s28 = scalar_lea.hbm %s821_s1, 256 }
   0xe   : > { %p523_p8 = scmp.ne.s32.totalorder %s821_s1, %s522_s28  ;;  %p529_p12 = scmp.lt.u32.totalorder %s522_s28, %s821_s1 }
   0xf   : > { %p712_p7 = pnand %p456_p6, %p692_p1 }
  0x11   : > { %p524_p9 = pneg %p712_p7 }
  0x13   : > { %p525_p10 = pnand %p524_p9, %p523_p8 }
  0x15   : > { %p526_p11 = pneg %p525_p10 }
  0x17   : > { %p531_p13 = pnand %p529_p12, %p526_p11 }
  0x19   : > { %534 = shalt.err (!%p531_p13)
}
  0x1a   : > { %s535_s6 = scalar_lea.vmem %s155_s23, 256  ;;  %p543_p6 = scmp.lt.s32.totalorder %s155_s23, %s155_s23 }
  0x1b   : > { %p536_p0 = scmp.ne.s32.totalorder %s155_s23, %s535_s6  ;;  %p544_p1 = scmp.lt.s32.totalorder %s535_s6, %s535_s6 }
  0x1d   : > { %p538_p2 = pnand %p536_p0, %p524_p9  ;;  %p545_p4 = por %p544_p1, %p543_p6 }
  0x1f   : > { %p539_p3 = pneg %p538_p2 }
  0x21   : > { %p546_p5 = pnand %p545_p4, %p539_p3 }
  0x23   : > { %549 = shalt.err (!%p546_p5)
}
  0x24   : > { %s637_s7 = smov 64   ;;  %s638_s8 = smov 4  }
  0x25   : > { %459 = dma.hbm_to_vmem [thread:$0]  (!%p712_p7), %s821_s1, 256, %s155_s23, [#allocation5], %s637_s7, %s637_s7, %s638_s8  }
  0x26   : > { %p31_p1 = scmp.ge.s32.totalorder %s29_s25, 2  ;;  %s36_s11 = sadd.s32 1, %s622_s14 }
  0x27   : > { %p43_p4 = scmp.ne.s32.totalorder %s622_s14, %s618_s13  ;;  %p44_p5 = scmp.eq.s32.totalorder %s634_s17, 0 }
  0x28   : > { %s842_s25 = smov (%p31_p1, %s29_s25), 0  ;;  %p465_p9 = scmp.lt.s32.totalorder %s634_s17, 2 }
  0x29   : > { %p45_p8 = por %p44_p5, %p43_p4  ;;  %s33_s12 = ssub.s32 %s630_s16, %s842_s25 }
  0x2a   : > { %s174_s18 = sand.u32 1, %s622_s14   ;;  %p34_p10 = scmp.eq.s32.totalorder %s33_s12, 0 }
  0x2b   : > { %s427_s22 = sshll.u32 %s174_s18, 3  ;;  %s428_s26 = sshll.u32 %s630_s16, 7 }
  0x2c   : > { %s745_s27 = scalar_select %p34_p10, %s622_s14, %s36_s11  }
  0x2d   : > { %s750_s23 = scalar_lea.hbm %s820_s0, %s428_s26  ;;  %s178_s29 = scalar_lea.vmem [#allocation2], %s427_s22 }
  0x2e   : > { %s185_s30 = sshll.u32 %s178_s29, 4  ;;  %p752_p7 = pnand %p465_p9, %p45_p8  ;;  %s756_s30 = int_to_ptr.vmem [resolvable:$true] %s185_s30 }
  0x2f   : > { %s175_s5 = scalar_lea.sflag [#allocation3], %s174_s18  ;;  %s550_s6 = scalar_lea.hbm %s750_s23, 128 }
  0x30   : > { %p551_p11 = scmp.ne.s32.totalorder %s750_s23, %s550_s6  ;;  %p552_p12 = pneg %p752_p7 }
  0x31   : > { %s555_s9 = scalar_lea.hbm %s820_s0, 256  ;;  %p556_p2 = scmp.lt.u32.totalorder %s750_s23, %s820_s0 }
  0x32   : > { %p553_p13 = pnand %p552_p12, %p551_p11  ;;  %p557_p3 = scmp.lt.u32.totalorder %s555_s9, %s550_s6 }
  0x33   : > { %p559_p1 = scmp.lt.u32.totalorder %s550_s6, %s750_s23 }
  0x34   : > { %p554_p0 = pneg %p553_p13  ;;  %p558_p6 = por %p557_p3, %p556_p2 }
  0x36   : > { %p560_p4 = por %p559_p1, %p558_p6 }
  0x38   : > { %p561_p5 = pnand %p560_p4, %p554_p0 }
  0x3a   : > { %564 = shalt.err (!%p561_p5)
}
  0x3b   : > { %s565_s12 = scalar_lea.vmem %s756_s30, 128  ;;  %s639_s18 = smov [#allocation2]  }
  0x3c   : > { %p566_p8 = scmp.ne.s32.totalorder %s756_s30, %s565_s12  ;;  %s570_s22 = sshll.u32 %s639_s18, 4  ;;  %s571_s22 = int_to_ptr.vmem [resolvable:$false] %s570_s22 }
  0x3d   : > { %s572_s26 = scalar_lea.vmem %s571_s22, 256  ;;  %p573_p11 = scmp.lt.s32.totalorder %s756_s30, %s571_s22 }
  0x3e   : > { %p568_p9 = pnand %p566_p8, %p552_p12  ;;  %p574_p13 = scmp.lt.s32.totalorder %s572_s26, %s565_s12 }
  0x40   : > { %p569_p10 = pneg %p568_p9  ;;  %p575_p2 = por %p574_p13, %p573_p11 }
  0x42   : > { %p576_p3 = pnand %p575_p2, %p569_p10 }
  0x44   : > { %579 = shalt.err (!%p576_p3)
}
  0x45   : > { %463 = dma.hbm_to_vmem [thread:$0]  (!%p752_p7), %s750_s23, 128, %s756_s30, %s175_s5  }
  0x46   : > { %p833_p0 = scmp.ne.s32.totalorder %s830_s21, 0 }
  0x47   : > { %s196_s24 = sand.u32 (!%p833_p0), 1, %s618_s13   ;;  %p834_p12 = scmp.ne.s32.totalorder (!%p833_p0), %s829_s20, 0 }
  0x48   : > { %194 = sbr.rel (%p833_p0) target bundleno = 309 (0x135), region = 32  ;;  %s430_s28 = sshll.u32 (!%p833_p0), %s196_s24, 3 }
  0x49   : > { %s197_s29 = scalar_lea.sflag (!%p833_p0), [#allocation3], %s196_s24  ;;  %s200_s6 = scalar_lea.vmem (!%p833_p0), [#allocation2], %s430_s28 }
  0x4f   : > { %605 = dma.done.wait (%p834_p12), %s197_s29, 128  }
  0x50   : > { %607 = vsyncadd (%p834_p12), %s197_s29, 4294967168  ;;  %p835_p6 = scmp.ne.s32.totalorder %s828_s19, 0 }
  0x52   : > { %609 = dma.done.wait (%p835_p6), [#allocation5], 256  }
  0x53   : > { %611 = vsyncadd (%p835_p6), [#allocation5], 4294967040  ;;  %v640_v0 = vmov 0.0   ;;  %vm641_vm0 = vmmov 0   ;;  %v520_v1 = vld [vmem:[#allocation4] sm:$0xff]   ;;  %v521_v2 = vld [vmem:[#allocation4 + $0x8] sm:$0xff]  }
  0x54   : > { %442 = vmatprep.subr.bf16.mxu0 %v640_v0  ;;  %446 = vmatprep.mubr.msk.bf16.mxu0 %vm641_vm0, %v640_v0  ;;  %v243_v3 = vld [vmem:[%s200_s6] sm:$0xff]  ;;  %vm268_vm1 = vcmask 261120   ;;  %p235_p7 = scmp.lt.s32.totalorder %s626_s15, 1 }
  0x55   : > { %443 = vmatpush3.bf16.msra.mxu0 %v520_v1  ;;  %v244_v4 = vpack.c.bf16 %v243_v3, %v243_v3  ;;  %v433_v5 = vld [vmem:[%s822_s2] ss:$0 sm:$0xff] }
  0x56   : > { %444 = vmatprep.subr.bf16.mxu0 %v640_v0  ;;  %s844_s15 = smov (!%p235_p7, %s626_s15), 1 }
  0x57   : > { %s432_s21 = sshll.u32 %s844_s15, 2 }
  0x58   : > { %s241_s4 = scalar_lea.vmem %s823_s3, %s432_s21 }
  0x59   : > { %445 = vmatpush3.bf16.msra.mxu0 %v521_v2 }
  0x5c   : > { %447 = vmatmul.mubr.msk.bf16.vlgmr.msra.gmra.mrb[0].mxu0 %vm268_vm1, %v244_v4 }
 0x12f   : > { %v306_v6 = vpop.f32.mrb[0].mxu0 }
 0x130   : > { %v307_v7 = vadd.f32 %v433_v5, %v306_v6  ;;  %v448_v8 = vpop.f32.mrb[1].mxu0 }
 0x131   : > { %v309_v9 = vpop.f32.mrb[2].mxu0 }
 0x132   : > { %v312_v10 = vpack.c.bf16 %v307_v7, %v307_v7  ;;  %v449_v11 = vpop.f32.mrb[3].mxu0 }
 0x134   : > { %313 = vst [vmem:[%s241_s4] sm:$0xf] %v312_v10 }
 0x135 PF: > { %s17_s17 = sadd.s32 1, %s634_s17   ;;  %s836_s12 = smov %s618_s13 }
 0x136   : > { %p14_p1 = scmp.ge.s32.totalorder %s17_s17, 4   ;;  %s837_s13 = smov %s622_s14 }
 0x137   : > { %s838_s14 = smov %s745_s27  ;;  %s839_s15 = smov %s630_s16 }
 0x138   : > { %s840_s16 = smov %s842_s25  ;;  %16 = sbr.rel (!%p14_p1) target bundleno = 5 (0x5), region = 80 }
 0x13f   :  { %339 = vsyncpa [#allocation3], 1 }
 0x140   :  { %341 = vsyncpa [#allocation3 + $0x1], 1 }
 0x141   :  { %342 = vsyncpa [#allocation5], 1 }

</bundles_post_ra>
